<compile_context>
chip_gen: v5e
topology: v5e:2x2
jax: 0.10.0
libtpu: 0.0.40
codegen_flags: <defaults>
</compile_context>

<pallas_src>
import functools

import jax
import jax.numpy as jnp
import numpy as np
from jax.experimental import pallas as pl
from jax.experimental.pallas import tpu as pltpu

# ----------------------------- model hyper-parameters -----------------------------
IMG_C, IMG_H, IMG_W = 3, 8, 8                 # full image, CHW
CONV_CO, CONV_K = 8, 3                        # conv: 3 -> 8 channels, 3x3, stride 1, VALID
CONV_HO, CONV_WO = IMG_H - CONV_K + 1, IMG_W - CONV_K + 1
IMG_FLAT = CONV_CO * CONV_HO * CONV_WO        # 288, flattened conv features (co, ho, wo)
IMG_HIDDEN = 32                               # full_img_network output size
HEALTH, POS, PANTRY, SHELF = 1, 2, 6, 6
INV_IN = PANTRY + SHELF + HEALTH + POS        # inventory_network input width (15)
INV_HIDDEN = 32
FUSED0 = IMG_FLAT + INV_HIDDEN                # 320: fused stage-0 output width
FINAL_HIDDEN = 64
ACTION_DIM = 8                                # final_network.output_size

SIZES = [IMG_C * IMG_H * IMG_W, HEALTH, POS, PANTRY, SHELF]
OBS_DIM = sum(SIZES)                          # 192 + 1 + 2 + 6 + 6 = 207
IMG_LEN = SIZES[0]                            # 192

_MAX_BATCH_TILE = 1024                        # safe on v5e/v6e/v7x scoped-VMEM defaults

_KPARAM_ORDER = ("w0", "b0", "wimg", "bimg", "w1i", "w1v", "b1", "w2", "b2")


# ----------------------------- fused Pallas kernel -----------------------------
def _fused_kernel(obs_ref, w0_ref, b0_ref, wimg_ref, bimg_ref,
                  w1i_ref, w1v_ref, b1_ref, w2_ref, b2_ref, out_ref):
    """obs tile -> fused conv+inventory matmul -> img/final linears -> softmax(8)."""
    x = obs_ref[...].astype(jnp.bfloat16)                                # (TB, 207)

    # Stage 0: one MXU pass over x.  Columns 0:288 = conv-as-matmul (co, ho, wo order),
    # columns 288:320 = inventory linear (obs-tail rows permuted at prepare time).
    y = jnp.dot(x, w0_ref[...], preferred_element_type=jnp.float32) + b0_ref[...]
    y = jnp.maximum(y, 0.0)                                              # (TB, 320)
    yb = y.astype(jnp.bfloat16)

    # Image hidden: rows 288:320 of wimg are zero, so h_inv never leaks in.
    h_img = jnp.dot(yb, wimg_ref[...],
                    preferred_element_type=jnp.float32) + bimg_ref[...]
    h_img = jnp.maximum(h_img, 0.0)                                      # (TB, 32)

    # torch.cat((h_img, h_inv), 1) @ W1 == h_img @ W1[:32] + h_inv @ W1[32:]
    # h_inv lives in y[:, 288:320]; w1v is zero-padded on rows 0:288 so we can feed y
    # directly (no lane slicing).
    z1 = (jnp.dot(h_img.astype(jnp.bfloat16), w1i_ref[...],
                  preferred_element_type=jnp.float32)
          + jnp.dot(yb, w1v_ref[...], preferred_element_type=jnp.float32)
          + b1_ref[...])
    z1 = jnp.maximum(z1, 0.0)                                            # (TB, 64)

    # Final 64x8 layer kept in f32 (tiny), then an exact softmax over the 8 actions.
    logits = jnp.dot(z1, w2_ref[...],
                     preferred_element_type=jnp.float32) + b2_ref[...]   # (TB, 8)
    m = jnp.max(logits, axis=-1, keepdims=True)
    e = jnp.exp(logits - m)
    out_ref[...] = e / jnp.sum(e, axis=-1, keepdims=True)


def _resident_spec(shape):
    # Weight/bias block == full array, same block index every grid step
    # -> stays VMEM-resident across batch tiles.
    return pl.BlockSpec(shape, lambda i: (0, 0))


def _round_up(x, m):
    return (x + m - 1) // m * m


@functools.partial(jax.jit, static_argnames=("batch_tile",))
def forward(kparams, obs, batch_tile=None):
    """Mirror of FoodNetworkMediumFullObs.forward (returns softmax action distribution)."""
    if obs.ndim < 2:
        obs = obs[None, :]
    obs = obs.astype(jnp.float32)
    B = obs.shape[0]
    assert obs.shape[1] == OBS_DIM, "not all of obs used"

    if batch_tile is not None:
        tb = int(batch_tile)
        assert tb % 8 == 0, "explicit batch_tile must be a multiple of 8"
    elif B <= 8:
        tb = B                                  # tiny batch: single (full-dim) block
    else:
        # Aim for >= 4 grid steps (>= 2 per TensorCore on v7x) and DMA/compute overlap;
        # cap keeps per-tile VMEM modest on every generation (v5e's 16 MiB scoped
        # default included).  v6e could raise the cap further if desired.
        tb = min(_MAX_BATCH_TILE, max(8, _round_up(pl.cdiv(B, 4), 8)))
    b_pad = _round_up(max(B, tb), tb)
    if b_pad != B:
        obs = jnp.pad(obs, ((0, b_pad - B), (0, 0)))

    weights = [kparams[k] for k in _KPARAM_ORDER]
    grid = (b_pad // tb,)

    flops = 2 * b_pad * (OBS_DIM * FUSED0 + FUSED0 * IMG_HIDDEN + FUSED0 * FINAL_HIDDEN
                         + IMG_HIDDEN * FINAL_HIDDEN + FINAL_HIDDEN * ACTION_DIM)
    weight_bytes = sum(int(np.prod(w.shape)) * w.dtype.itemsize for w in weights)
    bytes_accessed = b_pad * OBS_DIM * 4 + weight_bytes + b_pad * ACTION_DIM * 4

    out = pl.pallas_call(
        _fused_kernel,
        out_shape=jax.ShapeDtypeStruct((b_pad, ACTION_DIM), jnp.float32),
        grid_spec=pltpu.PrefetchScalarGridSpec(
            num_scalar_prefetch=0,
            grid=grid,
            in_specs=[pl.BlockSpec((tb, OBS_DIM), lambda i: (i, 0))]
                     + [_resident_spec(w.shape) for w in weights],
            out_specs=pl.BlockSpec((tb, ACTION_DIM), lambda i: (i, 0)),
        ),
        compiler_params=pltpu.CompilerParams(dimension_semantics=("parallel",)),
        cost_estimate=pl.CostEstimate(
            flops=int(flops),
            transcendentals=int(b_pad * ACTION_DIM),
            bytes_accessed=int(bytes_accessed)),
    )(obs, *weights)
    return out if b_pad == B else out[:B]


# ----------------------------- parameter construction -----------------------------
def init_params(key):
    """Raw torch-layout parameters (used by the pure-JAX reference)."""
    ks = jax.random.split(key, 12)

    def lin(k, fan_in, shape):
        return (jax.random.normal(k, shape, jnp.float32) / jnp.sqrt(fan_in)).astype(jnp.float32)

    return {
        # full_img_network: conv(3->8, 3x3) + relu, then linear(288 -> 32) + relu
        "conv_w": lin(ks[0], IMG_C * CONV_K * CONV_K, (CONV_CO, IMG_C, CONV_K, CONV_K)),
        "conv_b": lin(ks[1], IMG_C * CONV_K * CONV_K, (CONV_CO,)),
        "img_w": lin(ks[2], IMG_FLAT, (IMG_FLAT, IMG_HIDDEN)),
        "img_b": lin(ks[3], IMG_FLAT, (IMG_HIDDEN,)),
        # inventory_network: linear(concat(pantry, shelf, health, pos) -> 32) + relu
        "inv_w": lin(ks[4], INV_IN, (INV_IN, INV_HIDDEN)),
        "inv_b": lin(ks[5], INV_IN, (INV_HIDDEN,)),
        # final_network: linear(64 -> 64) + relu, linear(64 -> 8), softmax
        "fin1_w_img": lin(ks[6], IMG_HIDDEN + INV_HIDDEN, (IMG_HIDDEN, FINAL_HIDDEN)),
        "fin1_w_inv": lin(ks[7], IMG_HIDDEN + INV_HIDDEN, (INV_HIDDEN, FINAL_HIDDEN)),
        "fin1_b": lin(ks[8], IMG_HIDDEN + INV_HIDDEN, (FINAL_HIDDEN,)),
        "fin2_w": lin(ks[9], FINAL_HIDDEN, (FINAL_HIDDEN, ACTION_DIM)),
        "fin2_b": lin(ks[10], FINAL_HIDDEN, (ACTION_DIM,)),
    }


def prepare_kernel_params(params):
    """Host-side, one-time re-layout of the torch-style parameters for the fused kernel."""
    conv_w = np.asarray(params["conv_w"], np.float32)     # (Co, Ci, K, K)
    conv_b = np.asarray(params["conv_b"], np.float32)
    inv_w = np.asarray(params["inv_w"], np.float32)
    inv_b = np.asarray(params["inv_b"], np.float32)
    img_w = np.asarray(params["img_w"], np.float32)
    fin1_w_inv = np.asarray(params["fin1_w_inv"], np.float32)

    # (1) Fused stage-0 weight (207, 320):
    #     columns 0:288  = 3x3 VALID conv lowered to a dense matmul, torch flatten order
    #                      (co, ho, wo); obs-tail rows (192:207) stay zero.
    #     columns 288:320 = inventory linear; rows permuted from torch order
    #                      (pantry, shelf, health, pos) to the obs-tail order
    #                      (health, pos, pantry, shelf); image rows stay zero.
    w0 = np.zeros((OBS_DIM, FUSED0), np.float32)
    ho, wo = np.meshgrid(np.arange(CONV_HO), np.arange(CONV_WO), indexing="ij")
    out_pos = (ho * CONV_WO + wo).ravel()
    for co in range(CONV_CO):
        out_idx = co * CONV_HO * CONV_WO + out_pos
        for ci in range(IMG_C):
            for kh in range(CONV_K):
                for kw in range(CONV_K):
                    in_idx = (ci * IMG_H * IMG_W + (ho + kh) * IMG_W + (wo + kw)).ravel()
                    w0[in_idx, out_idx] = conv_w[co, ci, kh, kw]
    perm = np.array([12, 13, 14] + list(range(12)))       # obs-tail position -> inv_w row
    w0[IMG_LEN:OBS_DIM, IMG_FLAT:] = inv_w[perm, :]
    b0 = np.concatenate([np.repeat(conv_b, CONV_HO * CONV_WO), inv_b])[None, :]  # (1, 320)

    # (2) img linear padded to 320 rows (rows 288:320 zero) -> consumes y directly.
    wimg = np.zeros((FUSED0, IMG_HIDDEN), np.float32)
    wimg[:IMG_FLAT, :] = img_w

    # (3) final-hidden inventory weight padded to 320 rows (rows 0:288 zero)
    #     -> h_inv @ W1[32:] == y @ w1v without any lane slicing.
    w1v = np.zeros((FUSED0, FINAL_HIDDEN), np.float32)
    w1v[IMG_FLAT:, :] = fin1_w_inv

    kp = {
        # bf16 MXU operands (f32 accumulation in-kernel); final 64x8 layer stays f32.
        "w0": jnp.asarray(w0, jnp.bfloat16),
        "wimg": jnp.asarray(wimg, jnp.bfloat16),
        "w1i": jnp.asarray(np.asarray(params["fin1_w_img"], np.float32), jnp.bfloat16),
        "w1v": jnp.asarray(w1v, jnp.bfloat16),
        "w2": jnp.asarray(np.asarray(params["fin2_w"], np.float32), jnp.float32),
        # biases stay f32 (added after f32 accumulation)
        "b0": jnp.asarray(b0, jnp.float32),
        "bimg": jnp.asarray(np.asarray(params["img_b"], np.float32)[None, :], jnp.float32),
        "b1": jnp.asarray(np.asarray(params["fin1_b"], np.float32)[None, :], jnp.float32),
        "b2": jnp.asarray(np.asarray(params["fin2_b"], np.float32)[None, :], jnp.float32),
    }
    return kp


# ----------------------------- pure-JAX reference -----------------------------
def _reference_forward(params, obs):
    hp = jax.lax.Precision.HIGHEST
    cumsum, arrs = 0, []
    for size in SIZES:
        arrs.append(obs[:, cumsum:cumsum + size])
        cumsum += size
    full_img, health, pos, pantry, shelf = arrs
    B = obs.shape[0]
    x_img = full_img.reshape(B, IMG_C, IMG_H, IMG_W)
    conv = jax.lax.conv_general_dilated(
        x_img, params["conv_w"], (1, 1), "VALID",
        dimension_numbers=("NCHW", "OIHW", "NCHW"), precision=hp)
    conv = jnp.maximum(conv + params["conv_b"][None, :, None, None], 0.0)
    conv_feat = conv.reshape(B, IMG_FLAT)
    h_img = jnp.maximum(jnp.dot(conv_feat, params["img_w"], precision=hp) + params["img_b"], 0.0)
    inv_in = jnp.concatenate([pantry, shelf, health, pos], axis=1)
    h_inv = jnp.maximum(jnp.dot(inv_in, params["inv_w"], precision=hp) + params["inv_b"], 0.0)
    cat = jnp.concatenate([h_img, h_inv], axis=1)
    w1 = jnp.concatenate([params["fin1_w_img"], params["fin1_w_inv"]], axis=0)
    z1 = jnp.maximum(jnp.dot(cat, w1, precision=hp) + params["fin1_b"], 0.0)
    logits = jnp.dot(z1, params["fin2_w"], precision=hp) + params["fin2_b"]
    return jax.nn.softmax(logits, axis=-1)


# ----------------------------- main -----------------------------
if __name__ == "__main__":
    key = jax.random.PRNGKey(0)
    pkey, okey = jax.random.split(key)
    params = init_params(pkey)
    kparams = prepare_kernel_params(params)

    # Tolerances: kernel uses bf16 MXU operands with f32 accumulation; ~5e-4 expected
    # absolute error on the probabilities, 5e-3 gives a 10x margin.
    ATOL = RTOL = 5e-3

    # (a) small batch: single block, grid=(1,)
    batch = 2
    obs = jax.random.uniform(okey, (batch, OBS_DIM), jnp.float32)
    out = jax.block_until_ready(forward(kparams, obs))
    assert out.shape == (batch, ACTION_DIM)
    ref = _reference_forward(params, obs)
    assert jnp.allclose(out, ref, atol=ATOL, rtol=RTOL)
    # softmax uses an exact divide -> rows sum to 1 to f32 precision
    assert jnp.allclose(jnp.sum(out, axis=-1), jnp.ones((batch,)), atol=1e-3)

    # (b) explicit tile: tiled, padded-batch path (grid=2, resident weights)
    batch2 = 13
    obs2 = jax.random.uniform(jax.random.PRNGKey(1), (batch2, OBS_DIM), jnp.float32)
    out2 = jax.block_until_ready(forward(kparams, obs2, batch_tile=8))
    ref2 = _reference_forward(params, obs2)
    assert out2.shape == (batch2, ACTION_DIM)
    assert jnp.allclose(out2, ref2, atol=ATOL, rtol=RTOL)

    # (c) default tile selection (multi-step grid + batch padding)
    batch3 = 40
    obs3 = jax.random.uniform(jax.random.PRNGKey(2), (batch3, OBS_DIM), jnp.float32)
    out3 = jax.block_until_ready(forward(kparams, obs3))
    ref3 = _reference_forward(params, obs3)
    assert out3.shape == (batch3, ACTION_DIM)
    assert jnp.allclose(out3, ref3, atol=ATOL, rtol=RTOL)
    assert jnp.allclose(jnp.sum(out3, axis=-1), jnp.ones((batch3,)), atol=1e-3)

    # TODO(synk): get_action's Categorical(...).sample() is host-side RNG sampling and is
    # intentionally not implemented as a kernel.
    print("KERNEL_OK")
</pallas_src>

<mosaic_0001>
module attributes {stable_mosaic.version = 11 : i64} {
  func.func @_fused_kernel(%arg0: i32, %arg1: memref<2x207xf32, #tpu.memory_space<vmem>>, %arg2: memref<207x320xbf16, #tpu.memory_space<vmem>>, %arg3: memref<1x320xf32, #tpu.memory_space<vmem>>, %arg4: memref<320x32xbf16, #tpu.memory_space<vmem>>, %arg5: memref<1x32xf32, #tpu.memory_space<vmem>>, %arg6: memref<32x64xbf16, #tpu.memory_space<vmem>>, %arg7: memref<320x64xbf16, #tpu.memory_space<vmem>>, %arg8: memref<1x64xf32, #tpu.memory_space<vmem>>, %arg9: memref<64x8xf32, #tpu.memory_space<vmem>>, %arg10: memref<1x8xf32, #tpu.memory_space<vmem>>, %arg11: memref<2x8xf32, #tpu.memory_space<vmem>>) attributes {dimension_semantics = [#tpu.dimension_semantics<parallel>], iteration_bounds = array<i64: 1>, scalar_prefetch = 0 : i64, scratch_operands = 0 : i64, tpu.core_type = #tpu.core_type<tc>, window_params = [{transform_indices = @transform_0, window_bounds = array<i64: 2, 207>}, {pipeline_mode = #tpu.pipeline_mode<synchronous>, transform_indices = @transform_1, window_bounds = array<i64: 207, 320>}, {pipeline_mode = #tpu.pipeline_mode<synchronous>, transform_indices = @transform_2, window_bounds = array<i64: 1, 320>}, {pipeline_mode = #tpu.pipeline_mode<synchronous>, transform_indices = @transform_3, window_bounds = array<i64: 320, 32>}, {pipeline_mode = #tpu.pipeline_mode<synchronous>, transform_indices = @transform_4, window_bounds = array<i64: 1, 32>}, {pipeline_mode = #tpu.pipeline_mode<synchronous>, transform_indices = @transform_5, window_bounds = array<i64: 32, 64>}, {pipeline_mode = #tpu.pipeline_mode<synchronous>, transform_indices = @transform_6, window_bounds = array<i64: 320, 64>}, {pipeline_mode = #tpu.pipeline_mode<synchronous>, transform_indices = @transform_7, window_bounds = array<i64: 1, 64>}, {pipeline_mode = #tpu.pipeline_mode<synchronous>, transform_indices = @transform_8, window_bounds = array<i64: 64, 8>}, {pipeline_mode = #tpu.pipeline_mode<synchronous>, transform_indices = @transform_9, window_bounds = array<i64: 1, 8>}, {transform_indices = @transform_10, window_bounds = array<i64: 2, 8>}]} {
    %c0 = arith.constant 0 : index
    %c0_0 = arith.constant 0 : index
    %0 = vector.load %arg1[%c0, %c0_0] : memref<2x207xf32, #tpu.memory_space<vmem>>, vector<2x207xf32>
    %1 = arith.truncf %0 : vector<2x207xf32> to vector<2x207xbf16>
    %c0_1 = arith.constant 0 : index
    %c0_2 = arith.constant 0 : index
    %2 = vector.load %arg2[%c0_1, %c0_2] : memref<207x320xbf16, #tpu.memory_space<vmem>>, vector<207x320xbf16>
    %cst = arith.constant dense<0.000000e+00> : vector<2x320xf32>
    %3 = tpu.matmul %1, %2, %cst {dimension_numbers = #tpu.dot_dimension_numbers<[1], [0], [0], [1], [0, 0, 1, 1], [], []>} : vector<2x207xbf16>, vector<207x320xbf16>, vector<2x320xf32> -> vector<2x320xf32>
    %c0_3 = arith.constant 0 : index
    %c0_4 = arith.constant 0 : index
    %4 = vector.load %arg3[%c0_3, %c0_4] : memref<1x320xf32, #tpu.memory_space<vmem>>, vector<1x320xf32>
    %5 = vector.broadcast %4 : vector<1x320xf32> to vector<2x320xf32>
    %6 = arith.addf %3, %5 : vector<2x320xf32>
    %cst_5 = arith.constant 0.000000e+00 : f32
    %7 = vector.broadcast %cst_5 : f32 to vector<2x320xf32>
    %8 = arith.maximumf %6, %7 : vector<2x320xf32>
    %9 = arith.truncf %8 : vector<2x320xf32> to vector<2x320xbf16>
    %c0_6 = arith.constant 0 : index
    %c0_7 = arith.constant 0 : index
    %10 = vector.load %arg4[%c0_6, %c0_7] : memref<320x32xbf16, #tpu.memory_space<vmem>>, vector<320x32xbf16>
    %cst_8 = arith.constant dense<0.000000e+00> : vector<2x32xf32>
    %11 = tpu.matmul %9, %10, %cst_8 {dimension_numbers = #tpu.dot_dimension_numbers<[1], [0], [0], [1], [0, 0, 1, 1], [], []>} : vector<2x320xbf16>, vector<320x32xbf16>, vector<2x32xf32> -> vector<2x32xf32>
    %c0_9 = arith.constant 0 : index
    %c0_10 = arith.constant 0 : index
    %12 = vector.load %arg5[%c0_9, %c0_10] : memref<1x32xf32, #tpu.memory_space<vmem>>, vector<1x32xf32>
    %13 = vector.broadcast %12 : vector<1x32xf32> to vector<2x32xf32>
    %14 = arith.addf %11, %13 : vector<2x32xf32>
    %cst_11 = arith.constant 0.000000e+00 : f32
    %15 = vector.broadcast %cst_11 : f32 to vector<2x32xf32>
    %16 = arith.maximumf %14, %15 : vector<2x32xf32>
    %17 = arith.truncf %16 : vector<2x32xf32> to vector<2x32xbf16>
    %c0_12 = arith.constant 0 : index
    %c0_13 = arith.constant 0 : index
    %18 = vector.load %arg6[%c0_12, %c0_13] : memref<32x64xbf16, #tpu.memory_space<vmem>>, vector<32x64xbf16>
    %cst_14 = arith.constant dense<0.000000e+00> : vector<2x64xf32>
    %19 = tpu.matmul %17, %18, %cst_14 {dimension_numbers = #tpu.dot_dimension_numbers<[1], [0], [0], [1], [0, 0, 1, 1], [], []>} : vector<2x32xbf16>, vector<32x64xbf16>, vector<2x64xf32> -> vector<2x64xf32>
    %c0_15 = arith.constant 0 : index
    %c0_16 = arith.constant 0 : index
    %20 = vector.load %arg7[%c0_15, %c0_16] : memref<320x64xbf16, #tpu.memory_space<vmem>>, vector<320x64xbf16>
    %cst_17 = arith.constant dense<0.000000e+00> : vector<2x64xf32>
    %21 = tpu.matmul %9, %20, %cst_17 {dimension_numbers = #tpu.dot_dimension_numbers<[1], [0], [0], [1], [0, 0, 1, 1], [], []>} : vector<2x320xbf16>, vector<320x64xbf16>, vector<2x64xf32> -> vector<2x64xf32>
    %22 = arith.addf %19, %21 : vector<2x64xf32>
    %c0_18 = arith.constant 0 : index
    %c0_19 = arith.constant 0 : index
    %23 = vector.load %arg8[%c0_18, %c0_19] : memref<1x64xf32, #tpu.memory_space<vmem>>, vector<1x64xf32>
    %24 = vector.broadcast %23 : vector<1x64xf32> to vector<2x64xf32>
    %25 = arith.addf %22, %24 : vector<2x64xf32>
    %cst_20 = arith.constant 0.000000e+00 : f32
    %26 = vector.broadcast %cst_20 : f32 to vector<2x64xf32>
    %27 = arith.maximumf %25, %26 : vector<2x64xf32>
    %c0_21 = arith.constant 0 : index
    %c0_22 = arith.constant 0 : index
    %28 = vector.load %arg9[%c0_21, %c0_22] : memref<64x8xf32, #tpu.memory_space<vmem>>, vector<64x8xf32>
    %cst_23 = arith.constant dense<0.000000e+00> : vector<2x8xf32>
    %29 = tpu.matmul %27, %28, %cst_23 {dimension_numbers = #tpu.dot_dimension_numbers<[1], [0], [0], [1], [0, 0, 1, 1], [], []>} : vector<2x64xf32>, vector<64x8xf32>, vector<2x8xf32> -> vector<2x8xf32>
    %c0_24 = arith.constant 0 : index
    %c0_25 = arith.constant 0 : index
    %30 = vector.load %arg10[%c0_24, %c0_25] : memref<1x8xf32, #tpu.memory_space<vmem>>, vector<1x8xf32>
    %31 = vector.broadcast %30 : vector<1x8xf32> to vector<2x8xf32>
    %32 = arith.addf %29, %31 : vector<2x8xf32>
    %cst_26 = arith.constant dense<0xFF800000> : vector<2xf32>
    %33 = vector.multi_reduction <maximumf>, %32, %cst_26 [1] : vector<2x8xf32> to vector<2xf32>
    %34 = vector.shape_cast %33 : vector<2xf32> to vector<2x1xf32>
    %35 = vector.broadcast %34 : vector<2x1xf32> to vector<2x8xf32>
    %36 = arith.subf %32, %35 : vector<2x8xf32>
    %37 = math.exp %36 : vector<2x8xf32>
    %cst_27 = arith.constant dense<0.000000e+00> : vector<2xf32>
    %38 = vector.multi_reduction <add>, %37, %cst_27 [1] : vector<2x8xf32> to vector<2xf32>
    %39 = vector.shape_cast %38 : vector<2xf32> to vector<2x1xf32>
    %40 = vector.broadcast %39 : vector<2x1xf32> to vector<2x8xf32>
    %41 = arith.divf %37, %40 : vector<2x8xf32>
    %c0_28 = arith.constant 0 : index
    %c0_29 = arith.constant 0 : index
    %42 = vector.load %arg11[%c0_28, %c0_29] : memref<2x8xf32, #tpu.memory_space<vmem>>, vector<2x8xf32>
    tpu.vector_store %arg11[%c0_28, %c0_29], %41 {strides = array<i32>} : memref<2x8xf32, #tpu.memory_space<vmem>>, vector<2x8xf32>,
    return
  }
  func.func @transform_0(%arg0: i32) -> (i32, i32) {
    %c0_i32 = arith.constant 0 : i32
    %c0_i32_0 = arith.constant 0 : i32
    return %arg0, %c0_i32 : i32, i32
  }
  func.func @transform_1(%arg0: i32) -> (i32, i32) {
    %c0_i32 = arith.constant 0 : i32
    %c0_i32_0 = arith.constant 0 : i32
    %c0_i32_1 = arith.constant 0 : i32
    return %c0_i32, %c0_i32_0 : i32, i32
  }
  func.func @transform_2(%arg0: i32) -> (i32, i32) {
    %c0_i32 = arith.constant 0 : i32
    %c0_i32_0 = arith.constant 0 : i32
    %c0_i32_1 = arith.constant 0 : i32
    return %c0_i32, %c0_i32_0 : i32, i32
  }
  func.func @transform_3(%arg0: i32) -> (i32, i32) {
    %c0_i32 = arith.constant 0 : i32
    %c0_i32_0 = arith.constant 0 : i32
    %c0_i32_1 = arith.constant 0 : i32
    return %c0_i32, %c0_i32_0 : i32, i32
  }
  func.func @transform_4(%arg0: i32) -> (i32, i32) {
    %c0_i32 = arith.constant 0 : i32
    %c0_i32_0 = arith.constant 0 : i32
    %c0_i32_1 = arith.constant 0 : i32
    return %c0_i32, %c0_i32_0 : i32, i32
  }
  func.func @transform_5(%arg0: i32) -> (i32, i32) {
    %c0_i32 = arith.constant 0 : i32
    %c0_i32_0 = arith.constant 0 : i32
    %c0_i32_1 = arith.constant 0 : i32
    return %c0_i32, %c0_i32_0 : i32, i32
  }
  func.func @transform_6(%arg0: i32) -> (i32, i32) {
    %c0_i32 = arith.constant 0 : i32
    %c0_i32_0 = arith.constant 0 : i32
    %c0_i32_1 = arith.constant 0 : i32
    return %c0_i32, %c0_i32_0 : i32, i32
  }
  func.func @transform_7(%arg0: i32) -> (i32, i32) {
    %c0_i32 = arith.constant 0 : i32
    %c0_i32_0 = arith.constant 0 : i32
    %c0_i32_1 = arith.constant 0 : i32
    return %c0_i32, %c0_i32_0 : i32, i32
  }
  func.func @transform_8(%arg0: i32) -> (i32, i32) {
    %c0_i32 = arith.constant 0 : i32
    %c0_i32_0 = arith.constant 0 : i32
    %c0_i32_1 = arith.constant 0 : i32
    return %c0_i32, %c0_i32_0 : i32, i32
  }
  func.func @transform_9(%arg0: i32) -> (i32, i32) {
    %c0_i32 = arith.constant 0 : i32
    %c0_i32_0 = arith.constant 0 : i32
    %c0_i32_1 = arith.constant 0 : i32
    return %c0_i32, %c0_i32_0 : i32, i32
  }
  func.func @transform_10(%arg0: i32) -> (i32, i32) {
    %c0_i32 = arith.constant 0 : i32
    %c0_i32_0 = arith.constant 0 : i32
    return %arg0, %c0_i32 : i32, i32
  }
}

</mosaic_0001>

<bundles_post_ra>
// kernel: forward.1
= control target key start
LH: loop header
LB: loop body
LE: loop exit
PB: predicated region body
PF: predicated region fallthrough
CT: control target
= control target key end

     0   :  { %vm315_vm0 = vcmask 1046528   ;;  %vm316_vm1 = vcmask 1047552   ;;  %v1383_v14 = vmov 65535   ;;  %vm311_vm2 = vcmask 646144   ;;  %s1856_s0 = inlined_call_operand.vmem [shape: f32[2,207], index: 0, kind: input, shape index: {}]   ;;  %s1857_s1 = inlined_call_operand.vmem [shape: bf16[207,320], index: 1, kind: input, shape index: {}]   ;;  %s1858_s2 = inlined_call_operand.vmem [shape: f32[1,320], index: 2, kind: input, shape index: {}]   ;;  %s1859_s3 = inlined_call_operand.vmem [shape: bf16[320,32], index: 3, kind: input, shape index: {}]   ;;  %s1860_s4 = inlined_call_operand.vmem [shape: f32[1,32], index: 4, kind: input, shape index: {}]   ;;  %s1861_s5 = inlined_call_operand.vmem [shape: bf16[32,64], index: 5, kind: input, shape index: {}]   ;;  %s1862_s6 = inlined_call_operand.vmem [shape: bf16[320,64], index: 6, kind: input, shape index: {}]   ;;  %s1863_s7 = inlined_call_operand.vmem [shape: f32[1,64], index: 7, kind: input, shape index: {}]   ;;  %s1864_s8 = inlined_call_operand.vmem [shape: f32[64,8], index: 8, kind: input, shape index: {}]   ;;  %s1865_s9 = inlined_call_operand.vmem [shape: f32[1,8], index: 9, kind: input, shape index: {}]   ;;  %s1866_s10 = inlined_call_operand.hbm [shape: f32[2,8], index: 10, kind: output, shape index: {}]  }
   0x1   :  { %v1022_v0 = vld [vmem:[%s1857_s1 + $0xa8] sm:$0xf]  ;;  %v1289_v1 = vld [vmem:[%s1857_s1 + $0xb0] sm:$0xf0]  ;;  %v1288_v2 = vld [vmem:[%s1857_s1 + $0xac] sm:$0xf] }
   0x2   :  { %v1023_v3 = vor.u32 %v1289_v1, %v1022_v0  ;;  %v1024_v4 = vld [vmem:[%s1857_s1 + $0xb4] sm:$0xf0]  ;;  %v1082_v5 = vld [vmem:[%s1857_s1 + $0x120] sm:$0xf]  ;;  %v1304_v6 = vld [vmem:[%s1857_s1 + $0x128] sm:$0xf0] }
   0x3   :  { %v1027_v7 = vor.u32 %v1288_v2, %v1024_v4  ;;  %v1083_v8 = vor.u32 %v1304_v6, %v1082_v5  ;;  %v1303_v9 = vld [vmem:[%s1857_s1 + $0x124] sm:$0xf]  ;;  %v1084_v10 = vld [vmem:[%s1857_s1 + $0x12c] sm:$0xf0]  ;;  %v1286_v13 = vld [vmem:[%s1857_s1 + $0x98] sm:$0xf0] }
   0x4   :  { %328 = vmatpush.bf16.msra.mxu0 %v1023_v3  ;;  %v1087_v11 = vor.u32 %v1303_v9, %v1084_v10  ;;  %v1010_v12 = vld [vmem:[%s1857_s1 + $0x90] sm:$0xf]  ;;  %v317_v15 = vsel %vm315_vm0, 4294967295, %v1383_v14  ;;  %v1285_v17 = vld [vmem:[%s1857_s1 + $0x94] sm:$0xf] }
   0x5   :  { %354 = vmatpush.bf16.msra.mxu2 %v1027_v7  ;;  %v1011_v16 = vor.u32 %v1286_v13, %v1010_v12  ;;  %v1012_v18 = vld [vmem:[%s1857_s1 + $0x9c] sm:$0xf0]  ;;  %v1476_v19 = vsel %vm316_vm1, %v317_v15, 0  ;;  %v1070_v21 = vld [vmem:[%s1857_s1 + $0x108] sm:$0xf] }
   0x6   :  { %v1015_v20 = vor.u32 %v1285_v17, %v1012_v18  ;;  %v1301_v22 = vld [vmem:[%s1857_s1 + $0x110] sm:$0xf0]  ;;  %v320_v23 = vand.u32 %v1083_v8, %v1476_v19  ;;  %v323_v24 = vand.u32 %v1087_v11, %v1476_v19  ;;  %v1300_v25 = vld [vmem:[%s1857_s1 + $0x10c] sm:$0xf]  ;;  %v1072_v26 = vld [vmem:[%s1857_s1 + $0x114] sm:$0xf0] }
   0x7   :  { %v998_v27 = vld [vmem:[%s1857_s1 + $0x78] sm:$0xf]  ;;  %v1283_v28 = vld [vmem:[%s1857_s1 + $0x80] sm:$0xf0]  ;;  %v1282_v29 = vld [vmem:[%s1857_s1 + $0x7c] sm:$0xf]  ;;  %v1071_v31 = vor.u32 %v1301_v22, %v1070_v21  ;;  %v1075_v32 = vor.u32 %v1300_v25, %v1072_v26 }
   0x8   :  { %329 = vmatpush.bf16.msra.mxu0 %v1011_v16  ;;  %v1000_v30 = vld [vmem:[%s1857_s1 + $0x84] sm:$0xf0]  ;;  %344 = vmatpush.bf16.msra.mxu1 %v320_v23  ;;  %v999_v33 = vor.u32 %v1283_v28, %v998_v27  ;;  %v1058_v34 = vld [vmem:[%s1857_s1 + $0xf0] sm:$0xf]  ;;  %v1298_v35 = vld [vmem:[%s1857_s1 + $0xf8] sm:$0xf0] }
   0x9   :  { %370 = vmatpush.bf16.msra.mxu3 %v323_v24  ;;  %v1297_v36 = vld [vmem:[%s1857_s1 + $0xf4] sm:$0xf]  ;;  %355 = vmatpush.bf16.msra.mxu2 %v1015_v20  ;;  %v1003_v37 = vor.u32 %v1282_v29, %v1000_v30  ;;  %v1060_v38 = vld [vmem:[%s1857_s1 + $0xfc] sm:$0xf0]  ;;  %v1280_v40 = vld [vmem:[%s1857_s1 + $0x68] sm:$0xf0]  ;;  %v1059_v44 = vor.u32 %v1298_v35, %v1058_v34 }
   0xa   :  { %v986_v39 = vld [vmem:[%s1857_s1 + $0x60] sm:$0xf]  ;;  %v1279_v41 = vld [vmem:[%s1857_s1 + $0x64] sm:$0xf]  ;;  %v988_v42 = vld [vmem:[%s1857_s1 + $0x6c] sm:$0xf0]  ;;  %v1063_v45 = vor.u32 %v1297_v36, %v1060_v38 }
   0xb   :  { %v987_v43 = vor.u32 %v1280_v40, %v986_v39  ;;  %v1046_v46 = vld [vmem:[%s1857_s1 + $0xd8] sm:$0xf]  ;;  %v974_v47 = vld [vmem:[%s1857_s1 + $0x48] sm:$0xf]  ;;  %v1277_v48 = vld [vmem:[%s1857_s1 + $0x50] sm:$0xf0]  ;;  %v991_v49 = vor.u32 %v1279_v41, %v988_v42 }
   0xc   :  { %330 = vmatpush.bf16.msra.mxu0 %v999_v33  ;;  %345 = vmatpush.bf16.msra.mxu1 %v1071_v31  ;;  %v1295_v50 = vld [vmem:[%s1857_s1 + $0xe0] sm:$0xf0]  ;;  %v1294_v51 = vld [vmem:[%s1857_s1 + $0xdc] sm:$0xf]  ;;  %v1048_v52 = vld [vmem:[%s1857_s1 + $0xe4] sm:$0xf0]  ;;  %v975_v55 = vor.u32 %v1277_v48, %v974_v47 }
   0xd   :  { %371 = vmatpush.bf16.msra.mxu3 %v1075_v32  ;;  %356 = vmatpush.bf16.msra.mxu2 %v1003_v37  ;;  %v1276_v53 = vld [vmem:[%s1857_s1 + $0x4c] sm:$0xf]  ;;  %v976_v54 = vld [vmem:[%s1857_s1 + $0x54] sm:$0xf0]  ;;  %v1034_v56 = vld [vmem:[%s1857_s1 + $0xc0] sm:$0xf]  ;;  %v1047_v59 = vor.u32 %v1295_v50, %v1046_v46  ;;  %v1051_v60 = vor.u32 %v1294_v51, %v1048_v52 }
   0xe   :  { %v1090_v57 = vld [vmem:[%s1857_s1 + $0x128] sm:$0xf]  ;;  %v1305_v58 = vld [vmem:[%s1857_s1 + $0x130] sm:$0xf0]  ;;  %v1292_v61 = vld [vmem:[%s1857_s1 + $0xc8] sm:$0xf0]  ;;  %v979_v0 = vor.u32 %v1276_v53, %v976_v54 }
   0xf   :  { %v962_v62 = vld [vmem:[%s1857_s1 + $0x30] sm:$0xf]  ;;  %v1274_v63 = vld [vmem:[%s1857_s1 + $0x38] sm:$0xf0]  ;;  %v1291_v1 = vld [vmem:[%s1857_s1 + $0xc4] sm:$0xf]  ;;  %v1091_v3 = vor.u32 %v1305_v58, %v1090_v57  ;;  %v1035_v10 = vor.u32 %v1292_v61, %v1034_v56 }
  0x10   :  { %331 = vmatpush.bf16.msra.mxu0 %v987_v43  ;;  %346 = vmatpush.bf16.msra.mxu1 %v1059_v44  ;;  %v1036_v2 = vld [vmem:[%s1857_s1 + $0xcc] sm:$0xf0]  ;;  %v37_v4 = vld [vmem:[%s1856_s0] sm:$0xf]  ;;  %v1290_v6 = vld [vmem:[%s1857_s1 + $0xb8] sm:$0xf0]  ;;  %v963_v7 = vor.u32 %v1274_v63, %v962_v62 }
  0x11   :  { %372 = vmatpush.bf16.msra.mxu3 %v1063_v45  ;;  %357 = vmatpush.bf16.msra.mxu2 %v991_v49  ;;  %v1030_v5 = vld [vmem:[%s1857_s1 + $0xb0] sm:$0xf]  ;;  %39 = vst [vmem:[#allocation1] ss:$4 sm:$0xff] %v37_v4  ;;  %v1273_v8 = vld [vmem:[%s1857_s1 + $0x34] sm:$0xf]  ;;  %v1039_v11 = vor.u32 %v1291_v1, %v1036_v2  ;;  %v326_v15 = vand.u32 %v1091_v3, %v1476_v19 }
  0x12   :  { %v964_v9 = vld [vmem:[%s1857_s1 + $0x3c] sm:$0xf0]  ;;  %v950_v12 = vld [vmem:[%s1857_s1 + $0x18] sm:$0xf]  ;;  %v1271_v13 = vld [vmem:[%s1857_s1 + $0x20] sm:$0xf0]  ;;  %v1031_v14 = vor.u32 %v1290_v6, %v1030_v5 }
  0x13   :  { %v1018_v16 = vld [vmem:[%s1857_s1 + $0x98] sm:$0xf]  ;;  %v967_v17 = vor.u32 %v1273_v8, %v964_v9  ;;  %v1287_v18 = vld [vmem:[%s1857_s1 + $0xa0] sm:$0xf0]  ;;  %v1078_v20 = vld [vmem:[%s1857_s1 + $0x110] sm:$0xf]  ;;  %v951_v22 = vor.u32 %v1271_v13, %v950_v12 }
  0x14   :  { %332 = vmatpush.bf16.msra.mxu0 %v975_v55  ;;  %347 = vmatpush.bf16.msra.mxu1 %v1047_v59  ;;  %v1302_v21 = vld [vmem:[%s1857_s1 + $0x118] sm:$0xf0]  ;;  %v952_v23 = vld [vmem:[%s1857_s1 + $0x24] sm:$0xf0]  ;;  %v1006_v24 = vld [vmem:[%s1857_s1 + $0x80] sm:$0xf]  ;;  %v1019_v28 = vor.u32 %v1287_v18, %v1018_v16 }
  0x15   :  { %373 = vmatpush.bf16.msra.mxu3 %v1051_v60  ;;  %358 = vmatpush.bf16.msra.mxu2 %v979_v0  ;;  %v1270_v19 = vld [vmem:[%s1857_s1 + $0x1c] sm:$0xf]  ;;  %v938_v25 = vld [vmem:[%s1857_s1] sm:$0xf]  ;;  %v1268_v26 = vld [vmem:[%s1857_s1 + $0x8] sm:$0xf0]  ;;  %v1079_v29 = vor.u32 %v1302_v21, %v1078_v20 }
  0x16   :  { %v1284_v30 = vld [vmem:[%s1857_s1 + $0x88] sm:$0xf0]  ;;  %v955_v32 = vor.u32 %v1270_v19, %v952_v23  ;;  %v1066_v33 = vld [vmem:[%s1857_s1 + $0xf8] sm:$0xf]  ;;  %v1299_v34 = vld [vmem:[%s1857_s1 + $0x100] sm:$0xf0]  ;;  %v939_v36 = vor.u32 %v1268_v26, %v938_v25 }
  0x17   :  { %v1267_v35 = vld [vmem:[%s1857_s1 + $0x4] sm:$0xf]  ;;  %v940_v37 = vld [vmem:[%s1857_s1 + $0xc] sm:$0xf0]  ;;  %v1007_v39 = vor.u32 %v1284_v30, %v1006_v24  ;;  %v1067_v40 = vor.u32 %v1299_v34, %v1066_v33  ;;  %v1313_v41 = vld [vmem:[%s1859_s3 + $0x38] sm:$0xff] }
  0x18   :  { %333 = vmatpush.bf16.msra.mxu0 %v963_v7  ;;  %348 = vmatpush.bf16.msra.mxu1 %v1035_v10  ;;  %v41_v27 = vld.sshfl [vmem:[#allocation1 + $0x8] sm:$0xff pattern:$0x73625140]  ;;  %v40_v38 = vld.sshfl [vmem:[#allocation1] sm:$0xff pattern:$0x73625140]  ;;  %v943_v42 = vor.u32 %v1267_v35, %v940_v37 }
  0x19   :  { %374 = vmatpush.bf16.msra.mxu3 %v1039_v11  ;;  %359 = vmatpush.bf16.msra.mxu2 %v967_v17  ;;  %v45_v31 = vpack.c.bf16 %v41_v27, %v41_v27  ;;  %v44_v43 = vpack.c.bf16 %v40_v38, %v40_v38  ;;  %v994_v44 = vld [vmem:[%s1857_s1 + $0x68] sm:$0xf]  ;;  %v1281_v45 = vld [vmem:[%s1857_s1 + $0x70] sm:$0xf0]  ;;  %v1054_v46 = vld [vmem:[%s1857_s1 + $0xe0] sm:$0xf] }
  0x1a   :  { %v1296_v47 = vld [vmem:[%s1857_s1 + $0xe8] sm:$0xf0]  ;;  %v1321_v48 = vld [vmem:[%s1859_s3 + $0x78] sm:$0xff]  ;;  %v1312_v49 = vld [vmem:[%s1859_s3 + $0x30] sm:$0xff]  ;;  %v995_v50 = vor.u32 %v1281_v45, %v994_v44 }
  0x1b   :  { %1092 = vmatmul.msk.bf16.vlgmr.msra.gmra.mxu1 %vm311_vm2, %v45_v31 }
  0x1c   :  { %380 = vmatpush.bf16.msrb.mxu1 %v1031_v14  ;;  %334 = vmatpush.bf16.msra.mxu0 %v951_v22 }
  0x1d   :  { %396 = vmatpush.bf16.msrb.mxu3 %v326_v15  ;;  %360 = vmatpush.bf16.msra.mxu2 %v955_v32 }
  0x1e   :  { %1093 = vmatmul.msk.bf16.vlgmr.msra.gmra.mxu3 %vm311_vm2, %v45_v31 }
  0x20   :  { %381 = vmatpush.bf16.msrb.mxu1 %v1019_v28  ;;  %335 = vmatpush.bf16.msra.mxu0 %v939_v36 }
  0x21   :  { %397 = vmatpush.bf16.msrb.mxu3 %v1079_v29 }
  0x24   :  { %580 = vmatpush.bf16.msrb.mxu0 %v1313_v41  ;;  %382 = vmatpush.bf16.msrb.mxu1 %v1007_v39 }
  0x25   :  { %398 = vmatpush.bf16.msrb.mxu3 %v1067_v40 }
  0x26   :  { %15 = vsyncpa [#allocation3], 0  ;;  %361 = vmatpush.bf16.msra.mxu2 %v943_v42  ;;  %336 = vmatmul.bf16.vlgmr.msra.gmra.mxu0 %v44_v43  ;;  %v1055_v51 = vor.u32 %v1296_v47, %v1054_v46  ;;  %v982_v52 = vld [vmem:[%s1857_s1 + $0x50] sm:$0xf]  ;;  %v1278_v53 = vld [vmem:[%s1857_s1 + $0x58] sm:$0xf0] }
  0x27   :  { %v1042_v54 = vld [vmem:[%s1857_s1 + $0xc8] sm:$0xf]  ;;  %v1293_v55 = vld [vmem:[%s1857_s1 + $0xd0] sm:$0xf0]  ;;  %v983_v58 = vor.u32 %v1278_v53, %v982_v52  ;;  %v970_v60 = vld [vmem:[%s1857_s1 + $0x38] sm:$0xf] }
  0x28   :  { %v1320_v56 = vld [vmem:[%s1859_s3 + $0x70] sm:$0xff]  ;;  %581 = vmatpush.bf16.msrb.mxu0 %v1312_v49  ;;  %v1311_v57 = vld [vmem:[%s1859_s3 + $0x28] sm:$0xff]  ;;  %383 = vmatpush.bf16.msrb.mxu1 %v995_v50  ;;  %v1043_v59 = vor.u32 %v1293_v55, %v1042_v54  ;;  %v1275_v61 = vld [vmem:[%s1857_s1 + $0x40] sm:$0xf0]  ;;  %vm576_vm3 = vcmask 523264   ;;  %vm836_vm4 = vcmask 261120  }
  0x29   :  { %362 = vmatmul.bf16.vlgmr.msra.gmra.mxu2 %v44_v43  ;;  %399 = vmatpush.bf16.msrb.mxu3 %v1055_v51  ;;  %v1319_v62 = vld [vmem:[%s1859_s3 + $0x68] sm:$0xff]  ;;  %v1310_v63 = vld [vmem:[%s1859_s3 + $0x20] sm:$0xff]  ;;  %v971_v0 = vor.u32 %v1275_v61, %v970_v60  ;;  %v1309_v3 = vld [vmem:[%s1859_s3 + $0x18] sm:$0xff]  ;;  %vm894_vm5 = vcmask 58368  }
  0x2a   :  { %593 = vmatpush.bf16.msrb.mxu2 %v1321_v48  ;;  %v958_v1 = vld [vmem:[%s1857_s1 + $0x20] sm:$0xf]  ;;  %v1272_v2 = vld [vmem:[%s1857_s1 + $0x28] sm:$0xf0]  ;;  %v946_v5 = vld [vmem:[%s1857_s1 + $0x8] sm:$0xf] }
  0x2b   :  { %v959_v4 = vor.u32 %v1272_v2, %v958_v1  ;;  %v1269_v6 = vld [vmem:[%s1857_s1 + $0x10] sm:$0xf0]  ;;  %v1335_v8 = vld [vmem:[%s1862_s6 + $0x38] sm:$0xff]  ;;  %v1333_v10 = vld [vmem:[%s1862_s6 + $0x28] sm:$0xff] }
  0x2c   :  { %582 = vmatpush.bf16.msrb.mxu0 %v1311_v57  ;;  %384 = vmatpush.bf16.msrb.mxu1 %v983_v58  ;;  %v947_v7 = vor.u32 %v1269_v6, %v946_v5  ;;  %v1334_v9 = vld [vmem:[%s1862_s6 + $0x30] sm:$0xff]  ;;  %v1332_v11 = vld [vmem:[%s1862_s6 + $0x20] sm:$0xff]  ;;  %v1331_v12 = vld [vmem:[%s1862_s6 + $0x18] sm:$0xff] }
  0x2d   :  { %400 = vmatpush.bf16.msrb.mxu3 %v1043_v59  ;;  %v1318_v13 = vld [vmem:[%s1859_s3 + $0x60] sm:$0xff]  ;;  %v1308_v14 = vld [vmem:[%s1859_s3 + $0x10] sm:$0xff]  ;;  %v1317_v16 = vld [vmem:[%s1859_s3 + $0x58] sm:$0xff] }
  0x2e   :  { %594 = vmatpush.bf16.msrb.mxu2 %v1320_v56  ;;  %v1330_v15 = vld [vmem:[%s1862_s6 + $0x10] sm:$0xff]  ;;  %v1325_v17 = vld [vmem:[%s1859_s3 + $0x98] sm:$0xff]  ;;  %v1307_v18 = vld [vmem:[%s1859_s3 + $0x8] sm:$0xff] }
  0x2f   :  { %v1329_v20 = vld [vmem:[%s1862_s6 + $0x8] sm:$0xff]  ;;  %v1316_v21 = vld [vmem:[%s1859_s3 + $0x50] sm:$0xff]  ;;  %v1306_v19 = vld [vmem:[%s1859_s3] sm:$0xff] }
  0x30   :  { %583 = vmatpush.bf16.msrb.mxu0 %v1310_v63  ;;  %1094 = vmatmul.msk.bf16.vlgmr.msrb.gmra.mxu3 %vm311_vm2, %v45_v31  ;;  %v1324_v22 = vld [vmem:[%s1859_s3 + $0x90] sm:$0xff]  ;;  %v1328_v23 = vld [vmem:[%s1862_s6] sm:$0xff]  ;;  %v1315_v24 = vld [vmem:[%s1859_s3 + $0x48] sm:$0xff] }
  0x31   :  { %385 = vmatpush.bf16.msrb.mxu1 %v971_v0  ;;  %610 = vmatpush.bf16.msra.mxu3 %v1325_v17  ;;  %v1323_v25 = vld [vmem:[%s1859_s3 + $0x88] sm:$0xff]  ;;  %v1314_v26 = vld [vmem:[%s1859_s3 + $0x40] sm:$0xff]  ;;  %v1343_v28 = vld [vmem:[%s1862_s6 + $0x78] sm:$0xff] }
  0x32   :  { %595 = vmatpush.bf16.msrb.mxu2 %v1319_v62  ;;  %v1322_v27 = vld [vmem:[%s1859_s3 + $0x80] sm:$0xff]  ;;  %v1347_v29 = vld [vmem:[%s1862_s6 + $0x98] sm:$0xff]  ;;  %v1342_v30 = vld [vmem:[%s1862_s6 + $0x70] sm:$0xff] }
  0x33   :  { %v1346_v31 = vld [vmem:[%s1862_s6 + $0x90] sm:$0xff]  ;;  %v1341_v32 = vld [vmem:[%s1862_s6 + $0x68] sm:$0xff]  ;;  %v98_v35 = vld [vmem:[%s1858_s2] sm:$0x7] }
  0x34   :  { %584 = vmatpush.bf16.msrb.mxu0 %v1309_v3  ;;  %v1345_v33 = vld [vmem:[%s1862_s6 + $0x88] sm:$0xff]  ;;  %v1340_v36 = vld [vmem:[%s1862_s6 + $0x60] sm:$0xff]  ;;  %v100_v38 = vperm.slane %v98_v35, 0  ;;  %v1339_v39 = vld [vmem:[%s1862_s6 + $0x58] sm:$0xff]  ;;  %v101_v47 = vperm.slane %v98_v35, 1  ;;  %v102_v60 = vperm.slane %v98_v35, 2 }
  0x35   :  { %386 = vmatpush.bf16.msrb.mxu1 %v959_v4  ;;  %611 = vmatpush.bf16.msra.mxu3 %v1324_v22  ;;  %v1344_v37 = vld [vmem:[%s1862_s6 + $0x80] sm:$0xff]  ;;  %v1337_v48 = vld [vmem:[%s1862_s6 + $0x48] sm:$0xff] }
  0x36   :  { %596 = vmatpush.bf16.msrb.mxu2 %v1318_v13  ;;  %v1336_v54 = vld [vmem:[%s1862_s6 + $0x40] sm:$0xff]  ;;  %v1327_v4 = vld [vmem:[%s1861_s5 + $0x8] sm:$0xff] }
  0x37   :  { %v1326_v5 = vld [vmem:[%s1861_s5] sm:$0xff] }
  0x38   :  { %585 = vmatpush.bf16.msrb.mxu0 %v1308_v14  ;;  %v1350_v13 = vld [vmem:[%s1860_s4] ss:$0 sm:$0xff] }
  0x39   :  { %387 = vmatpush.bf16.msrb.mxu1 %v947_v7  ;;  %612 = vmatpush.bf16.msra.mxu3 %v1323_v25  ;;  %v863_v17 = vld [vmem:[%s1864_s8 + $0x20] sm:$0xff] }
  0x3a   :  { %597 = vmatpush.bf16.msrb.mxu2 %v1317_v16 }
  0x3c   :  { %388 = vmatmul.bf16.vlgmr.msrb.gmra.mxu1 %v44_v43  ;;  %586 = vmatpush.bf16.msrb.mxu0 %v1307_v18  ;;  %v1338_v43 = vld [vmem:[%s1862_s6 + $0x50] sm:$0xff]  ;;  %s927_s6 = sshll.u32 %s1866_s10, 4  ;;  %s928_s6 = int_to_ptr.hbm [resolvable:$true] %s927_s6 }
  0x3d   :  { %785 = vmatpush.bf16.msra.mxu1 %v1335_v8  ;;  %613 = vmatpush.bf16.msra.mxu3 %v1322_v27 }
  0x3e   :  { %598 = vmatpush.bf16.msrb.mxu2 %v1316_v21 }
  0x40   :  { %587 = vmatpush.bf16.msrb.mxu0 %v1306_v19 }
  0x41   :  { %786 = vmatpush.bf16.msra.mxu1 %v1334_v9  ;;  %798 = vmatpush.bf16.msrb.mxu3 %v1343_v28 }
  0x42   :  { %599 = vmatpush.bf16.msrb.mxu2 %v1315_v24 }
  0x44   :  { %815 = vmatpush.bf16.msra.mxu0 %v1347_v29 }
  0x45   :  { %787 = vmatpush.bf16.msra.mxu1 %v1333_v10  ;;  %799 = vmatpush.bf16.msrb.mxu3 %v1342_v30 }
  0x46   :  { %600 = vmatpush.bf16.msrb.mxu2 %v1314_v26 }
  0x48   :  { %816 = vmatpush.bf16.msra.mxu0 %v1346_v31  ;;  %v861_v31 = vld [vmem:[%s1864_s8 + $0x10] sm:$0xff] }
  0x49   :  { %788 = vmatpush.bf16.msra.mxu1 %v1332_v11  ;;  %800 = vmatpush.bf16.msrb.mxu3 %v1341_v32  ;;  %v866_v11 = vld [vmem:[%s1864_s8 + $0x38] sm:$0xff]  ;;  %v860_v32 = vld [vmem:[%s1864_s8 + $0x8] sm:$0xff] }
  0x4a   :  { %846 = vmatpush.bf16.msra.mxu2 %v1327_v4 }
  0x4c   :  { %817 = vmatpush.bf16.msra.mxu0 %v1345_v33  ;;  %v859_v33 = vld [vmem:[%s1864_s8] sm:$0xff] }
  0x4d   :  { %789 = vmatpush.bf16.msra.mxu1 %v1331_v12  ;;  %801 = vmatpush.bf16.msrb.mxu3 %v1340_v36  ;;  %v865_v12 = vld [vmem:[%s1864_s8 + $0x30] sm:$0xff] }
  0x4e   :  { %847 = vmatpush.bf16.msra.mxu2 %v1326_v5 }
  0x50   :  { %818 = vmatpush.bf16.msra.mxu0 %v1344_v37 }
  0x51   :  { %790 = vmatpush.bf16.msra.mxu1 %v1330_v15  ;;  %802 = vmatpush.bf16.msrb.mxu3 %v1339_v39  ;;  %v864_v15 = vld [vmem:[%s1864_s8 + $0x28] sm:$0xff] }
  0x55   :  { %791 = vmatpush.bf16.msra.mxu1 %v1329_v20  ;;  %803 = vmatpush.bf16.msrb.mxu3 %v1338_v43  ;;  %v862_v20 = vld [vmem:[%s1864_s8 + $0x18] sm:$0xff] }
  0x59   :  { %792 = vmatpush.bf16.msra.mxu1 %v1328_v23  ;;  %804 = vmatpush.bf16.msrb.mxu3 %v1337_v48 }
  0x5d   :  { %805 = vmatpush.bf16.msrb.mxu3 %v1336_v54 }
  0x98   :  { %v350_v34 = vpop.f32.mrf.mxu1 }
  0xa0   :  { %v352_v44 = vpop.f32.mrf.mxu1 }
  0xa1   :  { %v376_v40 = vpop.f32.mrf.mxu3 }
  0xa3   :  { %v337_v41 = vpop.f32.mrf.mxu0 }
  0xa4   :  { %v338_v42 = vadd.f32 %v337_v41, %v100_v38 }
  0xa6   :  { %v351_v45 = vadd.f32 %v350_v34, %v338_v42  ;;  %v1351_v34 = vld [vmem:[%s1863_s7] ss:$0 sm:$0xff]  ;;  %s1384_s7 = smov [#allocation2]  }
  0xa7   :  { %s925_s8 = sshll.u32 %s1384_s7, 4  ;;  %s926_s8 = int_to_ptr.vmem [resolvable:$true] %s925_s8 }
  0xa8   :  { %v406_v46 = vmax.f32 %v351_v45, 0.0 }
  0xa9   :  { %v378_v50 = vpop.f32.mrf.mxu3 }
  0xaa   :  { %v409_v49 = vpack.c.bf16 %v406_v46, %v406_v46 }
  0xab   :  { %v339_v51 = vpop.f32.mrf.mxu0 }
  0xac   :  { %v363_v52 = vpop.f32.mrf.mxu2  ;;  %588 = vmatmul.bf16.vlgmr.msrb.gmra.mxu0 %v409_v49  ;;  %793 = vmatmul.bf16.vlgmr.msra.gmra.mxu1 %v409_v49 }
  0xad   :  { %v364_v53 = vadd.f32 %v363_v52, %v101_v47  ;;  %882 = vmatpush.msrb.mxu0 %v866_v11 }
  0xaf   :  { %v377_v55 = vadd.f32 %v376_v40, %v364_v53  ;;  %883 = vmatpush.msrb.mxu0 %v865_v12  ;;  %v1352_v40 = vld [vmem:[%s1865_s9] ss:$0 sm:$0xff] }
  0xb1   :  { %v407_v56 = vmax.f32 %v377_v55, 0.0  ;;  %884 = vmatpush.msrb.mxu0 %v864_v15 }
  0xb3   :  { %v410_v57 = vpack.c.bf16 %v407_v56, %v407_v56  ;;  %v402_v58 = vpop.f32.mrf.mxu3  ;;  %885 = vmatpush.msrb.mxu0 %v863_v17 }
  0xb4   :  { %v365_v59 = vpop.f32.mrf.mxu2 }
  0xb5   :  { %601 = vmatmul.bf16.vlgmr.msrb.gmra.mxu2 %v410_v57  ;;  %886 = vmatpush.msrb.mxu0 %v862_v20 }
  0xb7   :  { %887 = vmatpush.msrb.mxu0 %v861_v31 }
  0xb9   :  { %v389_v61 = vpop.f32.mrf.mxu1  ;;  %888 = vmatpush.msrb.mxu0 %v860_v32 }
  0xba   :  { %v390_v62 = vadd.f32 %v389_v61, %v102_v60 }
  0xbb   :  { %v404_v0 = vpop.f32.mrf.mxu3  ;;  %889 = vmatpush.msrb.mxu0 %v859_v33 }
  0xbc   :  { %v403_v63 = vadd.f32 %v402_v58, %v390_v62 }
  0xbe   :  { %v408_v1 = vmax.f32 %v403_v63, 0.0 }
  0xc0   :  { %v411_v2 = vpack.c.bf16 %v408_v1, %v408_v1 }
  0xc1   :  { %v391_v3 = vpop.f32.mrf.mxu1 }
  0xc2   :  { %1175 = vmatmul.msk.bf16.vlgmr.msra.gmra.mxu3 %vm576_vm3, %v411_v2  ;;  %1256 = vmatmul.msk.bf16.vlgmr.msra.gmra.mxu0 %vm576_vm3, %v411_v2 }
  0xd2   :  { %806 = vmatmul.bf16.vlgmr.msrb.gmra.mxu3 %v410_v57 }
 0x129   :  { %v589_v6 = vpop.f32.mrf.mxu0  ;;  %v794_v7 = vpop.f32.mrf.mxu1 }
 0x12a   :  { %v590_v18 = vadd.f32 %v1350_v13, %v589_v6 }
 0x131   :  { %v591_v8 = vpop.f32.mrf.mxu0  ;;  %v796_v9 = vpop.f32.mrf.mxu1 }
 0x138   :  { %v602_v10 = vpop.f32.mrf.mxu2 }
 0x139   :  { %v603_v21 = vadd.f32 %v602_v10, %v590_v18 }
 0x13f   :  { %v820_v14 = vpop.f32.mrf.mxu0 }
 0x140   :  { %v604_v16 = vpop.f32.mrf.mxu2 }
 0x145   :  { %v615_v22 = vpop.f32.mrf.mxu3 }
 0x146   :  { %v616_v19 = vadd.f32 %v615_v22, %v603_v21 }
 0x147   :  { %v822_v23 = vpop.f32.mrf.mxu0 }
 0x148   :  { %v619_v24 = vmax.f32 %v616_v19, 0.0 }
 0x14a   :  { %v620_v25 = vpack.c.bf16 %v619_v24, %v619_v24 }
 0x14c   :  { %1265 = vmatmul.msk.bf16.vlgmr.msra.gmra.mxu2 %vm836_vm4, %v620_v25 }
 0x14d   :  { %v617_v26 = vpop.f32.mrf.mxu3 }
 0x155   :  { %v807_v27 = vpop.f32.mrf.mxu3 }
 0x156   :  { %v808_v28 = vadd.f32 %v807_v27, %v794_v7 }
 0x158   :  { %v821_v29 = vadd.f32 %v820_v14, %v808_v28 }
 0x15d   :  { %v809_v30 = vpop.f32.mrf.mxu3 }
 0x1cf   :  { %v849_v35 = vpop.f32.mrf.mxu2 }
 0x1d0   :  { %v850_v36 = vadd.f32 %v849_v35, %v821_v29 }
 0x1d2   :  { %v857_v37 = vadd.f32 %v1351_v34, %v850_v36 }
 0x1d4   :  { %v858_v38 = vmax.f32 %v857_v37, 0.0 }
 0x1d6   :  { %1266 = vmatmul.msk.f32.vlgmr.msrb.gmra.mxu0 %vm576_vm3, %v858_v38 }
 0x1d7   :  { %v851_v39 = vpop.f32.mrf.mxu2 }
 0x253   :  { %v891_v41 = vpop.f32.mrf.mxu0 }
 0x254   :  { %v892_v42 = vadd.f32 %v1352_v40, %v891_v41 }
 0x256   :  { %v895_v43 = vsel %vm894_vm5, %v892_v42, -inf }
 0x257   :  { %896 = vmax.xlane.f32.xlu0 %v895_v43 }
 0x2ca   :  { %v897_v44 = vpop.xlane.xlu0 %896 }
 0x2cb   :  { %v898_v45 = vsub.f32 %v892_v42, %v897_v44 }
 0x2cd   :  { %v899_v46 = vmul.f32 1.442695, %v898_v45 }
 0x2cf   :  { %1353 = vpow2.f32 %v899_v46 }
 0x2d5   :  { %v1354_v47 = vpop.eup %1353 }
 0x2d6   :  { %v901_v48 = vsel %vm894_vm5, %v1354_v47, 0.0 }
 0x2d7   :  { %902 = vadd.xlane.f32.xlu0 %v901_v48 }
 0x34a   :  { %v903_v49 = vpop.xlane.xlu0 %902 }
 0x34b   :  { %1355 = vrcp.f32 %v903_v49  ;;  %v915_v53 = vand.u32 2147483648, %v903_v49  ;;  %v913_v55 = vand.u32 2147483647, %v903_v49  ;;  %vm909_vm7 = vweird.f32 %v903_v49 }
 0x34d   :  { %v916_v57 = vor.u32 1.1754944e-38, %v915_v53  ;;  %vm914_vm9 = vcmp.eq.f32.partialorder %v913_v55, 8.507059e+37 }
 0x351   :  { %v1356_v50 = vpop.eup %1355 }
 0x352   :  { %v905_v51 = vmul.f32 %v1356_v50, %v903_v49  ;;  %vm910_vm6 = vweird.f32 %v1356_v50 }
 0x353   :  { %vm911_vm8 = vmor %vm909_vm7, %vm910_vm6 }
 0x354   :  { %v906_v52 = vsub.f32 1.0, %v905_v51 }
 0x356   :  { %v907_v54 = vmul.f32 %v1356_v50, %v906_v52 }
 0x358   :  { %v908_v56 = vadd.f32 %v1356_v50, %v907_v54 }
 0x35a   :  { %v912_v58 = vsel %vm911_vm8, %v1356_v50, %v908_v56 }
 0x35b   :  { %v917_v59 = vsel %vm914_vm9, %v916_v57, %v912_v58 }
 0x35c   :  { %v918_v60 = vmul.f32 %v1354_v47, %v917_v59 }
 0x35e   :  { %919 = vst.msk [vmem:[#allocation2] sm:$0x3] %vm894_vm5, %v918_v60 }
 0x35f   :  { %930 = dma.vmem_to_hbm [thread:$0]  %s926_s8, 32, %s928_s6, [#allocation3]  }
 0x360   :  { %1381 = dma.done.wait [#allocation3], 32  }
 0x361   :  { %1382 = vsyncadd [#allocation3], 4294967264 }
 0x362   :  { %935 = vsyncpa [#allocation3], 1 }

</bundles_post_ra>
